<compile_context>
chip_gen: v5e
topology: v5e:2x2
jax: 0.10.0
libtpu: 0.0.40
codegen_flags: <defaults>
</compile_context>

<pallas_src>
import functools
import math

import jax
import jax.numpy as jnp
from jax.experimental import pallas as pl
from jax.experimental.pallas import tpu as pltpu


# Covers batch tiles up to ~32K lanes of f32 intermediates on v5e/v6e/v7x.
_VMEM_LIMIT_BYTES = 32 * 1024 * 1024


# ------------------------------------------------------------------ kernel --
def mlp_kernel(x_ref, w1_ref, b1_ref, w2_ref, b2_ref, w3_ref, b3_ref,
               w4t_ref, b4_ref, o_ref, *, mxu_dtype, precision):
    """Fused 1->16->64->8->1 MLP on a lane-major (features, batch) tile."""
    x = x_ref[...]                                        # (1, T), batch on lanes

    # fc1: K == 1 contraction -> VPU broadcast multiply, no MXU.
    h = jnp.maximum(w1_ref[...] * x + b1_ref[...], 0.0)  # (16, T)

    # fc2: (64,16) @ (16,T) on the MXU, f32 accumulation.
    h = jnp.dot(w2_ref[...].astype(mxu_dtype), h.astype(mxu_dtype),
                preferred_element_type=jnp.float32, precision=precision)
    h = jnp.maximum(h + b2_ref[...], 0.0)                 # (64, T)

    # fc3: (8,64) @ (64,T) on the MXU.
    h = jnp.dot(w3_ref[...].astype(mxu_dtype), h.astype(mxu_dtype),
                preferred_element_type=jnp.float32, precision=precision)
    h = jnp.maximum(h + b3_ref[...], 0.0)                 # (8, T)

    # fc4: single output feature -> elementwise mul + sublane reduce (XLU).
    out = jnp.sum(w4t_ref[...] * h, axis=0, keepdims=True) + b4_ref[...]
    o_ref[...] = out.astype(o_ref.dtype)


# ----------------------------------------------------------------- wrapper --
def _round_up(v, m):
    return ((v + m - 1) // m) * m


def _prep_params(params):
    """Torch-layout (out, in) weights + biases -> lane-major kernel operands."""
    w1, b1, w2, b2, w3, b3, w4, b4 = params
    return (
        w1.reshape(16, 1).astype(jnp.float32),
        b1.reshape(16, 1).astype(jnp.float32),
        w2.reshape(64, 16).astype(jnp.float32),
        b2.reshape(64, 1).astype(jnp.float32),
        w3.reshape(8, 64).astype(jnp.float32),
        b3.reshape(8, 1).astype(jnp.float32),
        w4.reshape(1, 8).T.astype(jnp.float32),            # (8, 1)
        b4.reshape(1, 1).astype(jnp.float32),
    )


def mlp_forward_lane_major(x_1n, params, *, tile_n=8192, mxu_dtype=jnp.float32):
    """x_1n: (1, N) f32 lane-major batch -> (1, N) f32 (copy-free layout)."""
    n = x_1n.shape[1]

    n128 = _round_up(max(n, 1), 128)
    tile = min(tile_n, n128)
    # v7x: guarantee >= 2 grid steps whenever there are >= 2 lane tiles of
    # work, so dimension_semantics=("parallel",) can use both TensorCores.
    if n128 >= 256 and pl.cdiv(n128, tile) < 2:
        tile = _round_up(pl.cdiv(n128, 2), 128)
    grid_n = pl.cdiv(n128, tile)
    n_pad = grid_n * tile

    if n_pad != n:   # ragged tail only; tile-multiple batches skip this copy
        x_1n = jnp.pad(x_1n, ((0, 0), (0, n_pad - n)))

    precision = (jax.lax.Precision.HIGHEST if mxu_dtype == jnp.float32
                 else jax.lax.Precision.DEFAULT)
    kern = functools.partial(mlp_kernel, mxu_dtype=mxu_dtype,
                             precision=precision)

    def resident(shape):
        # Full-array block, DMA'd once and kept resident across the grid.
        return pl.BlockSpec(shape, lambda i: (0, 0))

    w1, b1, w2, b2, w3, b3, w4t, b4 = _prep_params(params)

    out_1n = pl.pallas_call(
        kern,
        out_shape=jax.ShapeDtypeStruct((1, n_pad), x_1n.dtype),
        grid=(grid_n,),
        in_specs=[
            pl.BlockSpec((1, tile), lambda i: (0, i)),     # streamed batch tile
            resident((16, 1)), resident((16, 1)),          # fc1
            resident((64, 16)), resident((64, 1)),         # fc2
            resident((8, 64)), resident((8, 1)),           # fc3
            resident((8, 1)), resident((1, 1)),            # fc4
        ],
        out_specs=pl.BlockSpec((1, tile), lambda i: (0, i)),
        compiler_params=pltpu.CompilerParams(
            dimension_semantics=("parallel",),              # 2 TCs on v7x
            vmem_limit_bytes=_VMEM_LIMIT_BYTES),
    )(x_1n, w1, b1, w2, b2, w3, b3, w4t, b4)

    if n_pad != n:
        out_1n = out_1n[:, :n]
    return out_1n


def mlp_forward(x, params, *, tile_n=8192, mxu_dtype=jnp.float32):
    """x: (N, 1) f32 -> (N, 1) f32, same semantics as the torch module.

    The (N,1)<->(1,N) reshapes are free relayouts (same linear order); use
    mlp_forward_lane_major directly for a fully copy-free API.
    """
    n = x.shape[0]
    out = mlp_forward_lane_major(x.reshape(1, n), params,
                                 tile_n=tile_n, mxu_dtype=mxu_dtype)
    return out.reshape(n, 1)


# -------------------------------------------------------------------- init --
def init_linear(key, fan_in, fan_out):
    # Mirrors torch.nn.Linear default init: U(-1/sqrt(fan_in), 1/sqrt(fan_in)).
    # Weight kept in torch layout (out, in).
    kw, kb = jax.random.split(key)
    bound = 1.0 / math.sqrt(fan_in)
    w = jax.random.uniform(kw, (fan_out, fan_in), jnp.float32, -bound, bound)
    b = jax.random.uniform(kb, (fan_out,), jnp.float32, -bound, bound)
    return w, b


if __name__ == "__main__":
    key = jax.random.PRNGKey(0)
    k_x, k1, k2, k3, k4 = jax.random.split(key, 5)

    # fc1 (1->16), fc2 (16->64), fc3 (64->8), fc4 (8->1)
    w1, b1 = init_linear(k1, 1, 16)
    w2, b2 = init_linear(k2, 16, 64)
    w3, b3 = init_linear(k3, 64, 8)
    w4, b4 = init_linear(k4, 8, 1)
    params = (w1, b1, w2, b2, w3, b3, w4, b4)

    # Pure-JAX reference in strict f32 (torch layout: y = x @ W.T + b).
    hp = jax.lax.Precision.HIGHEST
    def ref(xv):
        h = jnp.maximum(jnp.dot(xv, w1.T, precision=hp) + b1, 0.0)
        h = jnp.maximum(jnp.dot(h, w2.T, precision=hp) + b2, 0.0)
        h = jnp.maximum(jnp.dot(h, w3.T, precision=hp) + b3, 0.0)
        return jnp.dot(h, w4.T, precision=hp) + b4

    # 1) Small batch of scalar inputs, shape (8, 1) — strict f32 parity path.
    x_small = jax.random.normal(k_x, (8, 1), jnp.float32)
    out = jax.block_until_ready(mlp_forward(x_small, params))
    assert out.shape == (8, 1)
    assert jnp.allclose(out, ref(x_small), atol=2e-5, rtol=2e-5)

    # 2) Ragged batch over multiple grid steps (exercises tiling + padding).
    x_mid = jax.random.normal(k_x, (300, 1), jnp.float32)
    out_mid = jax.block_until_ready(mlp_forward(x_mid, params, tile_n=256))
    assert out_mid.shape == (300, 1)
    assert jnp.allclose(out_mid, ref(x_mid), atol=2e-5, rtol=2e-5)

    # 3) bf16-operand MXU fast path (perf option from the review).
    out_bf16 = jax.block_until_ready(
        mlp_forward(x_mid, params, tile_n=256, mxu_dtype=jnp.bfloat16))
    assert out_bf16.shape == (300, 1)
    assert jnp.allclose(out_bf16, ref(x_mid), atol=5e-2, rtol=5e-2)

    print("KERNEL_OK")
</pallas_src>

<mosaic_0001>
module attributes {stable_mosaic.version = 11 : i64} {
  func.func @mlp_kernel(%arg0: i32, %arg1: memref<1x128xf32, #tpu.memory_space<vmem>>, %arg2: memref<16x1xf32, #tpu.memory_space<vmem>>, %arg3: memref<16x1xf32, #tpu.memory_space<vmem>>, %arg4: memref<64x16xf32, #tpu.memory_space<vmem>>, %arg5: memref<64x1xf32, #tpu.memory_space<vmem>>, %arg6: memref<8x64xf32, #tpu.memory_space<vmem>>, %arg7: memref<8x1xf32, #tpu.memory_space<vmem>>, %arg8: memref<8x1xf32, #tpu.memory_space<vmem>>, %arg9: memref<1x1xf32, #tpu.memory_space<vmem>>, %arg10: memref<1x128xf32, #tpu.memory_space<vmem>>) attributes {dimension_semantics = [#tpu.dimension_semantics<parallel>], iteration_bounds = array<i64: 1>, scalar_prefetch = 0 : i64, scratch_operands = 0 : i64, tpu.core_type = #tpu.core_type<tc>, window_params = [{transform_indices = @transform_0, window_bounds = array<i64: 1, 128>}, {pipeline_mode = #tpu.pipeline_mode<synchronous>, transform_indices = @transform_1, window_bounds = array<i64: 16, 1>}, {pipeline_mode = #tpu.pipeline_mode<synchronous>, transform_indices = @transform_2, window_bounds = array<i64: 16, 1>}, {pipeline_mode = #tpu.pipeline_mode<synchronous>, transform_indices = @transform_3, window_bounds = array<i64: 64, 16>}, {pipeline_mode = #tpu.pipeline_mode<synchronous>, transform_indices = @transform_4, window_bounds = array<i64: 64, 1>}, {pipeline_mode = #tpu.pipeline_mode<synchronous>, transform_indices = @transform_5, window_bounds = array<i64: 8, 64>}, {pipeline_mode = #tpu.pipeline_mode<synchronous>, transform_indices = @transform_6, window_bounds = array<i64: 8, 1>}, {pipeline_mode = #tpu.pipeline_mode<synchronous>, transform_indices = @transform_7, window_bounds = array<i64: 8, 1>}, {pipeline_mode = #tpu.pipeline_mode<synchronous>, transform_indices = @transform_8, window_bounds = array<i64: 1, 1>}, {transform_indices = @transform_9, window_bounds = array<i64: 1, 128>}]} {
    %c0 = arith.constant 0 : index
    %c0_0 = arith.constant 0 : index
    %0 = vector.load %arg1[%c0, %c0_0] : memref<1x128xf32, #tpu.memory_space<vmem>>, vector<1x128xf32>
    %c0_1 = arith.constant 0 : index
    %c0_2 = arith.constant 0 : index
    %1 = vector.load %arg2[%c0_1, %c0_2] : memref<16x1xf32, #tpu.memory_space<vmem>>, vector<16x1xf32>
    %2 = vector.broadcast %1 : vector<16x1xf32> to vector<16x128xf32>
    %3 = vector.broadcast %0 : vector<1x128xf32> to vector<16x128xf32>
    %4 = arith.mulf %2, %3 : vector<16x128xf32>
    %c0_3 = arith.constant 0 : index
    %c0_4 = arith.constant 0 : index
    %5 = vector.load %arg3[%c0_3, %c0_4] : memref<16x1xf32, #tpu.memory_space<vmem>>, vector<16x1xf32>
    %6 = vector.broadcast %5 : vector<16x1xf32> to vector<16x128xf32>
    %7 = arith.addf %4, %6 : vector<16x128xf32>
    %cst = arith.constant 0.000000e+00 : f32
    %8 = vector.broadcast %cst : f32 to vector<16x128xf32>
    %9 = arith.maximumf %7, %8 : vector<16x128xf32>
    %c0_5 = arith.constant 0 : index
    %c0_6 = arith.constant 0 : index
    %10 = vector.load %arg4[%c0_5, %c0_6] : memref<64x16xf32, #tpu.memory_space<vmem>>, vector<64x16xf32>
    %cst_7 = arith.constant dense<0.000000e+00> : vector<64x128xf32>
    %11 = tpu.matmul %10, %9, %cst_7 {dimension_numbers = #tpu.dot_dimension_numbers<[1], [0], [0], [1], [0, 0, 1, 1], [], []>, precision = #tpu.contract_precision<fp32>} : vector<64x16xf32>, vector<16x128xf32>, vector<64x128xf32> -> vector<64x128xf32>
    %c0_8 = arith.constant 0 : index
    %c0_9 = arith.constant 0 : index
    %12 = vector.load %arg5[%c0_8, %c0_9] : memref<64x1xf32, #tpu.memory_space<vmem>>, vector<64x1xf32>
    %13 = vector.broadcast %12 : vector<64x1xf32> to vector<64x128xf32>
    %14 = arith.addf %11, %13 : vector<64x128xf32>
    %cst_10 = arith.constant 0.000000e+00 : f32
    %15 = vector.broadcast %cst_10 : f32 to vector<64x128xf32>
    %16 = arith.maximumf %14, %15 : vector<64x128xf32>
    %c0_11 = arith.constant 0 : index
    %c0_12 = arith.constant 0 : index
    %17 = vector.load %arg6[%c0_11, %c0_12] : memref<8x64xf32, #tpu.memory_space<vmem>>, vector<8x64xf32>
    %cst_13 = arith.constant dense<0.000000e+00> : vector<8x128xf32>
    %18 = tpu.matmul %17, %16, %cst_13 {dimension_numbers = #tpu.dot_dimension_numbers<[1], [0], [0], [1], [0, 0, 1, 1], [], []>, precision = #tpu.contract_precision<fp32>} : vector<8x64xf32>, vector<64x128xf32>, vector<8x128xf32> -> vector<8x128xf32>
    %c0_14 = arith.constant 0 : index
    %c0_15 = arith.constant 0 : index
    %19 = vector.load %arg7[%c0_14, %c0_15] : memref<8x1xf32, #tpu.memory_space<vmem>>, vector<8x1xf32>
    %20 = vector.broadcast %19 : vector<8x1xf32> to vector<8x128xf32>
    %21 = arith.addf %18, %20 : vector<8x128xf32>
    %cst_16 = arith.constant 0.000000e+00 : f32
    %22 = vector.broadcast %cst_16 : f32 to vector<8x128xf32>
    %23 = arith.maximumf %21, %22 : vector<8x128xf32>
    %c0_17 = arith.constant 0 : index
    %c0_18 = arith.constant 0 : index
    %24 = vector.load %arg8[%c0_17, %c0_18] : memref<8x1xf32, #tpu.memory_space<vmem>>, vector<8x1xf32>
    %25 = vector.broadcast %24 : vector<8x1xf32> to vector<8x128xf32>
    %26 = arith.mulf %25, %23 : vector<8x128xf32>
    %cst_19 = arith.constant dense<0.000000e+00> : vector<128xf32>
    %27 = vector.multi_reduction <add>, %26, %cst_19 [0] : vector<8x128xf32> to vector<128xf32>
    %28 = vector.shape_cast %27 : vector<128xf32> to vector<1x128xf32>
    %c0_20 = arith.constant 0 : index
    %c0_21 = arith.constant 0 : index
    %29 = vector.load %arg9[%c0_20, %c0_21] : memref<1x1xf32, #tpu.memory_space<vmem>>, vector<1x1xf32>
    %30 = vector.broadcast %29 : vector<1x1xf32> to vector<1x128xf32>
    %31 = arith.addf %28, %30 : vector<1x128xf32>
    %c0_22 = arith.constant 0 : index
    %c0_23 = arith.constant 0 : index
    %32 = vector.load %arg10[%c0_22, %c0_23] : memref<1x128xf32, #tpu.memory_space<vmem>>, vector<1x128xf32>
    tpu.vector_store %arg10[%c0_22, %c0_23], %31 {strides = array<i32>} : memref<1x128xf32, #tpu.memory_space<vmem>>, vector<1x128xf32>,
    return
  }
  func.func @transform_0(%arg0: i32) -> (i32, i32) {
    %c0_i32 = arith.constant 0 : i32
    %c0_i32_0 = arith.constant 0 : i32
    return %c0_i32, %arg0 : i32, i32
  }
  func.func @transform_1(%arg0: i32) -> (i32, i32) {
    %c0_i32 = arith.constant 0 : i32
    %c0_i32_0 = arith.constant 0 : i32
    %c0_i32_1 = arith.constant 0 : i32
    return %c0_i32, %c0_i32_0 : i32, i32
  }
  func.func @transform_2(%arg0: i32) -> (i32, i32) {
    %c0_i32 = arith.constant 0 : i32
    %c0_i32_0 = arith.constant 0 : i32
    %c0_i32_1 = arith.constant 0 : i32
    return %c0_i32, %c0_i32_0 : i32, i32
  }
  func.func @transform_3(%arg0: i32) -> (i32, i32) {
    %c0_i32 = arith.constant 0 : i32
    %c0_i32_0 = arith.constant 0 : i32
    %c0_i32_1 = arith.constant 0 : i32
    return %c0_i32, %c0_i32_0 : i32, i32
  }
  func.func @transform_4(%arg0: i32) -> (i32, i32) {
    %c0_i32 = arith.constant 0 : i32
    %c0_i32_0 = arith.constant 0 : i32
    %c0_i32_1 = arith.constant 0 : i32
    return %c0_i32, %c0_i32_0 : i32, i32
  }
  func.func @transform_5(%arg0: i32) -> (i32, i32) {
    %c0_i32 = arith.constant 0 : i32
    %c0_i32_0 = arith.constant 0 : i32
    %c0_i32_1 = arith.constant 0 : i32
    return %c0_i32, %c0_i32_0 : i32, i32
  }
  func.func @transform_6(%arg0: i32) -> (i32, i32) {
    %c0_i32 = arith.constant 0 : i32
    %c0_i32_0 = arith.constant 0 : i32
    %c0_i32_1 = arith.constant 0 : i32
    return %c0_i32, %c0_i32_0 : i32, i32
  }
  func.func @transform_7(%arg0: i32) -> (i32, i32) {
    %c0_i32 = arith.constant 0 : i32
    %c0_i32_0 = arith.constant 0 : i32
    %c0_i32_1 = arith.constant 0 : i32
    return %c0_i32, %c0_i32_0 : i32, i32
  }
  func.func @transform_8(%arg0: i32) -> (i32, i32) {
    %c0_i32 = arith.constant 0 : i32
    %c0_i32_0 = arith.constant 0 : i32
    %c0_i32_1 = arith.constant 0 : i32
    return %c0_i32, %c0_i32_0 : i32, i32
  }
  func.func @transform_9(%arg0: i32) -> (i32, i32) {
    %c0_i32 = arith.constant 0 : i32
    %c0_i32_0 = arith.constant 0 : i32
    return %c0_i32, %arg0 : i32, i32
  }
}

</mosaic_0001>

<bundles_post_ra>
// kernel: tpu_custom_call.1
= control target key start
LH: loop header
LB: loop body
LE: loop exit
PB: predicated region body
PF: predicated region fallthrough
CT: control target
= control target key end

     0   :  { %s1168_s0 = inlined_call_operand.vmem [shape: f32[1,128], index: 0, kind: input, shape index: {}]   ;;  %s1169_s1 = inlined_call_operand.vmem [shape: f32[16,1], index: 1, kind: input, shape index: {}]   ;;  %s1170_s2 = inlined_call_operand.vmem [shape: f32[16,1], index: 2, kind: input, shape index: {}]   ;;  %s1171_s3 = inlined_call_operand.vmem [shape: f32[64,16], index: 3, kind: input, shape index: {}]   ;;  %s1172_s4 = inlined_call_operand.vmem [shape: f32[64,1], index: 4, kind: input, shape index: {}]   ;;  %s1173_s5 = inlined_call_operand.vmem [shape: f32[8,64], index: 5, kind: input, shape index: {}]   ;;  %s1174_s6 = inlined_call_operand.vmem [shape: f32[8,1], index: 6, kind: input, shape index: {}]   ;;  %s1175_s7 = inlined_call_operand.vmem [shape: f32[8,1], index: 7, kind: input, shape index: {}]   ;;  %s1176_s8 = inlined_call_operand.<no memory space> [shape: f32[1,1], index: 8, kind: input, shape index: {}]   ;;  %s1177_s9 = inlined_call_operand.hbm [shape: f32[1,128], index: 9, kind: output, shape index: {}]  }
   0x1   :  { %v14_v0 = vstv %s1176_s8 }
   0x2   :  { %15 = vst [vmem:[#allocation2] sm:$0x1] %v14_v0 }
   0x3   :  { %v54_v1 = vld [vmem:[%s1170_s2 + $0x8] sm:$0xff]  ;;  %v857_v3 = vmov 0  }
   0x4   :  { %v37_v2 = vld [vmem:[%s1169_s1 + $0x8] sm:$0xff]  ;;  %828 = vset.pattern.permute.xlu1 %v857_v3  ;;  %827 = vset.pattern.permute.xlu0 %v857_v3 }
   0x5   :  { %62 = vperm.xlu1 %828, %v54_v1   ;;  %45 = vperm.xlu0 %827, %v37_v2  }
   0x6   :  { %829 = vset.pattern.permute.xlu2 %v857_v3 }
   0x7   :  { %16 = vsyncpa [#allocation4], 0  ;;  %v53_v4 = vld [vmem:[%s1170_s2] sm:$0xff]  ;;  %v82_v7 = vld [vmem:[%s1172_s4 + $0x28] sm:$0xff]  ;;  %vm125_vm0 = vcmask 130048   ;;  %vm541_vm1 = vcmask 523264  }
   0x8   :  { %v36_v5 = vld [vmem:[%s1169_s1] sm:$0xff]  ;;  %v78_v8 = vld [vmem:[%s1172_s4 + $0x8] sm:$0xff]  ;;  %v79_v9 = vld [vmem:[%s1172_s4 + $0x10] sm:$0xff]  ;;  %s812_s30 = sshll.u32 %s1177_s9, 4  ;;  %s813_s30 = int_to_ptr.hbm [resolvable:$true] %s812_s30 }
   0x9   :  { %v81_v6 = vld [vmem:[%s1172_s4 + $0x20] sm:$0xff]  ;;  %v76_v13 = vld [vmem:[%s1171_s3 + $0x38] sm:$0xff]  ;;  %v70_v22 = vld [vmem:[%s1171_s3 + $0x8] sm:$0xff] }
   0xa   :  { %v783_v10 = vld [vmem:[%s1175_s7] sm:$0xff]  ;;  %v148_v15 = vsel %vm125_vm0, %v76_v13, 0  ;;  %v84_v26 = vld [vmem:[%s1172_s4 + $0x38] sm:$0xff]  ;;  %v130_v27 = vsel %vm125_vm0, %v70_v22, 0  ;;  %v71_v36 = vld [vmem:[%s1171_s3 + $0x10] sm:$0xff] }
   0xb   :  { %v535_v11 = vld [vmem:[%s1174_s6] sm:$0xff]  ;;  %v955_v18 = vand.u32 4294901760, %v148_v15  ;;  %122 = vperm.xlu2 %829, %v84_v26   ;;  %v972_v32 = vand.u32 4294901760, %v130_v27  ;;  %v83_v43 = vld [vmem:[%s1172_s4 + $0x30] sm:$0xff]  ;;  %v133_v44 = vsel %vm125_vm0, %v71_v36, 0  ;;  %v72_v54 = vld [vmem:[%s1171_s3 + $0x18] sm:$0xff] }
   0xc   :  { %v69_v12 = vld [vmem:[%s1171_s3] sm:$0xff]  ;;  %v991_v52 = vand.u32 4294901760, %v133_v44  ;;  %v80_v58 = vld [vmem:[%s1172_s4 + $0x18] sm:$0xff]  ;;  %v136_v59 = vsel %vm125_vm0, %v72_v54, 0 }
   0xd   :  { %57 = vperm.xlu1 %828, %v53_v4   ;;  %40 = vperm.xlu0 %827, %v36_v5   ;;  %v127_v14 = vsel %vm125_vm0, %v69_v12, 0  ;;  %v830_v16 = vld [vmem:[%s1168_s0] ss:$0 sm:$0xff]  ;;  %v964_v24 = vsub.f32 %v148_v15, %v955_v18  ;;  %v984_v42 = vsub.f32 %v130_v27, %v972_v32  ;;  %v1002_v0 = vand.u32 4294901760, %v136_v59 }
   0xe   :  { %v953_v17 = vand.u32 4294901760, %v127_v14  ;;  %v185_v57 = vsub.f32 %v133_v44, %v991_v52  ;;  %v73_v1 = vld [vmem:[%s1171_s3 + $0x20] sm:$0xff] }
   0xf   :  { %v226_v30 = vand.u32 4294901760, %v964_v24  ;;  %v178_v51 = vand.u32 4294901760, %v984_v42  ;;  %v193_v3 = vsub.f32 %v136_v59, %v1002_v0  ;;  %v77_v4 = vld [vmem:[%s1172_s4] sm:$0xff]  ;;  %v139_v5 = vsel %vm125_vm0, %v73_v1, 0 }
  0x10   :  { %v961_v23 = vsub.f32 %v127_v14, %v953_v17  ;;  %v186_v63 = vand.u32 4294901760, %v185_v57 }
  0x11   :  { %v227_v39 = vsub.f32 %v964_v24, %v226_v30  ;;  %v179_v56 = vsub.f32 %v984_v42, %v178_v51 }
  0x12   :  { %v170_v29 = vand.u32 4294901760, %v961_v23  ;;  %v187_v2 = vsub.f32 %v185_v57, %v186_v63 }
  0x13   :  { %117 = vperm.xlu2 %829, %v83_v43   ;;  %v228_v48 = vand.u32 4294901760, %v227_v39  ;;  %v180_v62 = vand.u32 4294901760, %v179_v56 }
  0x14   :  { %v171_v38 = vsub.f32 %v961_v23, %v170_v29 }
  0x15   :  { %107 = vperm.xlu1 %828, %v81_v6   ;;  %112 = vperm.xlu0 %827, %v82_v7   ;;  %v188_v6 = vand.u32 4294901760, %v187_v2  ;;  %v194_v7 = vand.u32 4294901760, %v193_v3 }
  0x16   :  { %v172_v47 = vand.u32 4294901760, %v171_v38 }
  0x1b   :  { %102 = vperm.xlu2 %829, %v80_v58  }
  0x1d   :  { %92 = vperm.xlu1 %828, %v78_v8   ;;  %97 = vperm.xlu0 %827, %v79_v9   ;;  %v200_v8 = vand.u32 4294901760, %v139_v5  ;;  %v74_v9 = vld [vmem:[%s1171_s3 + $0x28] sm:$0xff] }
  0x1e   :  { %v142_v12 = vsel %vm125_vm0, %v74_v9, 0 }
  0x1f   :  { %v208_v15 = vand.u32 4294901760, %v142_v12 }
  0x23   :  { %87 = vperm.xlu2 %829, %v77_v4  }
  0x25   :  { %786 = vperm.xlu1 %828, %v783_v10   ;;  %538 = vperm.xlu0 %827, %v535_v11   ;;  %v195_v10 = vsub.f32 %v193_v3, %v194_v7  ;;  %v201_v11 = vsub.f32 %v139_v5, %v200_v8 }
  0x27   :  { %v196_v13 = vand.u32 4294901760, %v195_v10  ;;  %v202_v14 = vand.u32 4294901760, %v201_v11 }
  0x77   :  { %v63_v19 = vpop.permute.xlu1 %62  ;;  %v46_v20 = vpop.permute.xlu0 %45 }
  0x78   :  { %v52_v21 = vmul.f32 %v830_v16, %v46_v20  ;;  %v209_v20 = vsub.f32 %v142_v12, %v208_v15 }
  0x7a   :  { %v66_v25 = vadd.f32 %v63_v19, %v52_v21  ;;  %v203_v19 = vsub.f32 %v201_v11, %v202_v14 }
  0x7c   :  { %v68_v28 = vmax.f32 %v66_v25, 0.0  ;;  %v204_v22 = vand.u32 4294901760, %v203_v19 }
  0x7e   :  { %v164_v31 = vand.u32 4294901760, %v68_v28 }
  0x7f   :  { %v41_v33 = vpop.permute.xlu0 %40  ;;  %v58_v37 = vpop.permute.xlu1 %57 }
  0x80   :  { %v248_v34 = vsub.f32 %v68_v28, %v164_v31  ;;  %v51_v35 = vmul.f32 %v830_v16, %v41_v33  ;;  %165 = vmatpush.msra.mxu0 %v164_v31  ;;  %821 = vmatpush.msra.mxu2 %v164_v31  ;;  %v75_v16 = vld [vmem:[%s1171_s3 + $0x30] sm:$0xff] }
  0x81   :  { %v145_v21 = vsel %vm125_vm0, %v75_v16, 0 }
  0x82   :  { %v65_v40 = vadd.f32 %v58_v37, %v51_v35  ;;  %v249_v41 = vand.u32 4294901760, %v248_v34  ;;  %v216_v25 = vand.u32 4294901760, %v145_v21 }
  0x84   :  { %v67_v45 = vmax.f32 %v65_v40, 0.0  ;;  %v250_v46 = vsub.f32 %v248_v34, %v249_v41  ;;  %v217_v27 = vsub.f32 %v145_v21, %v216_v25 }
  0x86   :  { %v166_v49 = vand.u32 4294901760, %v67_v45  ;;  %v251_v50 = vand.u32 4294901760, %v250_v46 }
  0x87   :  { %v108_v36 = vpop.permute.xlu1 %107 }
  0x88   :  { %167 = vmatpush.msra.mxu0 %v166_v49  ;;  %822 = vmatpush.msra.mxu2 %v166_v49  ;;  %v254_v53 = vsub.f32 %v67_v45, %v166_v49 }
  0x89   :  { %252 = vmatpush.msra.mxu1 %v251_v50  ;;  %823 = vmatpush.msra.mxu3 %v251_v50 }
  0x8a   :  { %173 = vmatmul.f32.vlgmr.msra.gmra.mxu0 %v172_v47  ;;  %229 = vmatmul.f32.vlgmr.msra.gmra.mxu2 %v228_v48  ;;  %v255_v55 = vand.u32 4294901760, %v254_v53 }
  0x8b   :  { %308 = vmatpush.msrb.mxu2 %v248_v34  ;;  %437 = vmatpush.msrb.mxu0 %v249_v41  ;;  %v796_v34 = vld [vmem:[#allocation2] sm:$0x1] }
  0x8c   :  { %v256_v60 = vsub.f32 %v254_v53, %v255_v55  ;;  %799 = vperm.xlu2 %829, %v796_v34  }
  0x8d   :  { %311 = vmatpush.msrb.mxu2 %v254_v53  ;;  %441 = vmatpush.msrb.mxu0 %v255_v55 }
  0x8e   :  { %v257_v61 = vand.u32 4294901760, %v256_v60 }
  0x8f   :  { %v93_v43 = vpop.permute.xlu1 %92 }
  0x90   :  { %258 = vmatpush.msra.mxu1 %v257_v61  ;;  %824 = vmatpush.msra.mxu3 %v257_v61 }
  0x91   :  { %260 = vmatmul.f32.vlgmr.msra.gmra.mxu1 %v953_v17  ;;  %288 = vmatmul.f32.vlgmr.msra.gmra.mxu3 %v955_v18 }
  0x92   :  { %181 = vmatmul.f32.gmra.mxu0 %v180_v62  ;;  %314 = vmatmul.f32.vlgmr.msrb.gmra.mxu2 %v961_v23  ;;  %v210_v23 = vand.u32 4294901760, %v209_v20 }
  0x93   :  { %368 = vmatpush.msrb.mxu3 %v164_v31  ;;  %490 = vmatpush.msrb.mxu1 %v164_v31 }
  0x94   :  { %v211_v26 = vsub.f32 %v209_v20, %v210_v23 }
  0x95   :  { %370 = vmatpush.msrb.mxu3 %v166_v49  ;;  %492 = vmatpush.msrb.mxu1 %v166_v49 }
  0x96   :  { %v212_v28 = vand.u32 4294901760, %v211_v26 }
  0x99   :  { %264 = vmatmul.f32.gmra.mxu1 %v972_v32  ;;  %374 = vmatmul.f32.vlgmr.msrb.gmra.mxu3 %v170_v29  ;;  %v218_v29 = vand.u32 4294901760, %v217_v27 }
  0x9a   :  { %189 = vmatmul.f32.gmra.mxu0 %v188_v6  ;;  %319 = vmatmul.f32.gmra.mxu2 %v984_v42  ;;  %v113_v42 = vpop.permute.xlu0 %112 }
  0x9b   :  { %v219_v31 = vsub.f32 %v217_v27, %v218_v29 }
  0x9d   :  { %v220_v33 = vand.u32 4294901760, %v219_v31 }
  0xa1   :  { %268 = vmatmul.f32.gmra.mxu1 %v991_v52  ;;  %380 = vmatmul.f32.gmra.mxu3 %v178_v51 }
  0xa2   :  { %197 = vmatmul.f32.gmra.mxu0 %v196_v13  ;;  %324 = vmatmul.f32.gmra.mxu2 %v185_v57 }
  0xa9   :  { %272 = vmatmul.f32.gmra.mxu1 %v1002_v0  ;;  %386 = vmatmul.f32.gmra.mxu3 %v186_v63 }
  0xaa   :  { %205 = vmatmul.f32.gmra.mxu0 %v204_v22  ;;  %329 = vmatmul.f32.gmra.mxu2 %v193_v3 }
  0xb1   :  { %276 = vmatmul.f32.gmra.mxu1 %v200_v8  ;;  %392 = vmatmul.f32.gmra.mxu3 %v194_v7 }
  0xb2   :  { %213 = vmatmul.f32.gmra.mxu0 %v212_v28  ;;  %334 = vmatmul.f32.gmra.mxu2 %v201_v11 }
  0xb9   :  { %280 = vmatmul.f32.gmra.mxu1 %v208_v15  ;;  %398 = vmatmul.f32.gmra.mxu3 %v202_v14 }
  0xba   :  { %221 = vmatmul.f32.gmra.mxu0 %v220_v33  ;;  %339 = vmatmul.f32.gmra.mxu2 %v209_v20 }
  0xc1   :  { %284 = vmatmul.f32.gmra.mxu1 %v216_v25  ;;  %404 = vmatmul.f32.gmra.mxu3 %v210_v23 }
  0xc2   :  { %344 = vmatmul.f32.gmra.mxu2 %v217_v27  ;;  %443 = vmatmul.f32.vlgmr.msrb.gmra.mxu0 %v953_v17 }
  0xc9   :  { %410 = vmatmul.f32.gmra.mxu3 %v218_v29  ;;  %494 = vmatmul.f32.vlgmr.msrb.gmra.mxu1 %v953_v17  ;;  %v1040_v17 = vpop.permute.xlu2 %122 }
  0xca   :  { %349 = vmatmul.f32.gmra.mxu2 %v964_v24  ;;  %447 = vmatmul.f32.gmra.mxu0 %v972_v32 }
  0xd1   :  { %416 = vmatmul.f32.gmra.mxu3 %v226_v30  ;;  %498 = vmatmul.f32.gmra.mxu1 %v972_v32  ;;  %v1042_v24 = vpop.permute.xlu2 %117 }
  0xd2   :  { %451 = vmatmul.f32.gmra.mxu0 %v991_v52 }
  0xd9   :  { %502 = vmatmul.f32.gmra.mxu1 %v991_v52  ;;  %v103_v30 = vpop.permute.xlu2 %102 }
  0xda   :  { %455 = vmatmul.f32.gmra.mxu0 %v1002_v0 }
  0xe1   :  { %506 = vmatmul.f32.gmra.mxu1 %v1002_v0  ;;  %v88_v35 = vpop.permute.xlu2 %87 }
  0xe2   :  { %459 = vmatmul.f32.gmra.mxu0 %v200_v8 }
  0xe9   :  { %510 = vmatmul.f32.gmra.mxu1 %v200_v8 }
  0xea   :  { %463 = vmatmul.f32.gmra.mxu0 %v208_v15 }
  0xf1   :  { %514 = vmatmul.f32.gmra.mxu1 %v208_v15 }
  0xf2   :  { %467 = vmatmul.f32.gmra.mxu0 %v216_v25 }
  0xf9   :  { %518 = vmatmul.f32.gmra.mxu1 %v216_v25 }
  0xfa   :  { %471 = vmatmul.f32.gmra.mxu0 %v955_v18 }
 0x101   :  { %522 = vmatmul.f32.gmra.mxu1 %v955_v18  ;;  %v98_v18 = vpop.permute.xlu0 %97 }
 0x107   :  { %v174_v32 = vpop.f32.mrf.mxu0 }
 0x108   :  { %v175_v37 = vadd.f32 %v174_v32, %v88_v35 }
 0x10d   :  { %v1046_v38 = vpop.f32.mrf.mxu2 }
 0x10e   :  { %v261_v39 = vpop.f32.mrf.mxu1 }
 0x10f   :  { %v182_v40 = vpop.f32.mrf.mxu0  ;;  %v262_v41 = vadd.f32 %v261_v39, %v175_v37 }
 0x110   :  { %v183_v45 = vadd.f32 %v182_v40, %v93_v43 }
 0x114   :  { %v1048_v44 = vpop.f32.mrf.mxu3 }
 0x115   :  { %v315_v46 = vpop.f32.mrf.mxu2 }
 0x116   :  { %v316_v47 = vadd.f32 %v315_v46, %v262_v41  ;;  %v265_v48 = vpop.f32.mrf.mxu1  ;;  %v231_v41 = vadd.f32 %v1046_v38, %v1040_v17 }
 0x117   :  { %v190_v49 = vpop.f32.mrf.mxu0  ;;  %v1050_v50 = vadd.f32 %v265_v48, %v183_v45 }
 0x118   :  { %v191_v52 = vadd.f32 %v190_v49, %v98_v18  ;;  %v290_v18 = vadd.f32 %v1048_v44, %v231_v41  ;;  %v534_v44 = vld [vmem:[%s1173_s5] sm:$0xff]  ;;  %s858_s5 = smov [#allocation3]  }
 0x119   :  { %s810_s27 = sshll.u32 %s858_s5, 4  ;;  %s811_s27 = int_to_ptr.vmem [resolvable:$true] %s810_s27 }
 0x11c   :  { %v375_v51 = vpop.f32.mrf.mxu3 }
 0x11d   :  { %v376_v53 = vadd.f32 %v375_v51, %v316_v47  ;;  %v320_v5 = vpop.f32.mrf.mxu2 }
 0x11e   :  { %v269_v54 = vpop.f32.mrf.mxu1 }
 0x11f   :  { %v198_v55 = vpop.f32.mrf.mxu0  ;;  %v270_v56 = vadd.f32 %v269_v54, %v191_v52 }
 0x120   :  { %v199_v57 = vadd.f32 %v198_v55, %v103_v30 }
 0x124   :  { %v381_v6 = vpop.f32.mrf.mxu3 }
 0x125   :  { %v325_v10 = vpop.f32.mrf.mxu2 }
 0x126   :  { %v273_v58 = vpop.f32.mrf.mxu1 }
 0x127   :  { %v206_v59 = vpop.f32.mrf.mxu0  ;;  %v274_v60 = vadd.f32 %v273_v58, %v199_v57  ;;  %v321_v58 = vadd.f32 %v320_v5, %v1050_v50 }
 0x128   :  { %v207_v61 = vadd.f32 %v206_v59, %v108_v36 }
 0x12c   :  { %v387_v11 = vpop.f32.mrf.mxu3 }
 0x12d   :  { %v330_v15 = vpop.f32.mrf.mxu2 }
 0x12e   :  { %v277_v62 = vpop.f32.mrf.mxu1  ;;  %v331_v46 = vadd.f32 %v330_v15, %v274_v60 }
 0x12f   :  { %v214_v63 = vpop.f32.mrf.mxu0  ;;  %v278_v0 = vadd.f32 %v277_v62, %v207_v61 }
 0x130   :  { %v215_v1 = vadd.f32 %v214_v63, %v113_v42  ;;  %v382_v63 = vadd.f32 %v381_v6, %v321_v58 }
 0x134   :  { %v393_v20 = vpop.f32.mrf.mxu3 }
 0x135   :  { %v335_v23 = vpop.f32.mrf.mxu2 }
 0x136   :  { %v281_v2 = vpop.f32.mrf.mxu1  ;;  %v336_v42 = vadd.f32 %v335_v23, %v278_v0 }
 0x137   :  { %v222_v3 = vpop.f32.mrf.mxu0  ;;  %v282_v4 = vadd.f32 %v281_v2, %v215_v1 }
 0x138   :  { %v223_v34 = vadd.f32 %v222_v3, %v1042_v24  ;;  %v326_v24 = vadd.f32 %v325_v10, %v270_v56 }
 0x13a   :  { %v388_v59 = vadd.f32 %v387_v11, %v326_v24 }
 0x13c   :  { %v399_v25 = vpop.f32.mrf.mxu3 }
 0x13d   :  { %v340_v28 = vpop.f32.mrf.mxu2  ;;  %v400_v47 = vadd.f32 %v399_v25, %v336_v42 }
 0x13e   :  { %v285_v7 = vpop.f32.mrf.mxu1  ;;  %v341_v39 = vadd.f32 %v340_v28, %v282_v4 }
 0x13f   :  { %v444_v8 = vpop.f32.mrf.mxu0  ;;  %v286_v36 = vadd.f32 %v285_v7, %v223_v34 }
 0x140   :  { %v445_v9 = vadd.f32 %v444_v8, %v376_v53  ;;  %v394_v53 = vadd.f32 %v393_v20, %v331_v46 }
 0x144   :  { %v405_v29 = vpop.f32.mrf.mxu3 }
 0x145   :  { %v345_v30 = vpop.f32.mrf.mxu2  ;;  %v406_v43 = vadd.f32 %v405_v29, %v341_v39 }
 0x146   :  { %v495_v12 = vpop.f32.mrf.mxu1  ;;  %v346_v40 = vadd.f32 %v345_v30, %v286_v36 }
 0x147   :  { %v448_v13 = vpop.f32.mrf.mxu0  ;;  %v1052_v14 = vadd.f32 %v495_v12, %v445_v9  ;;  %v543_v9 = vsel %vm541_vm1, %v534_v44, 0 }
 0x148   :  { %v449_v4 = vadd.f32 %v448_v13, %v382_v63 }
 0x14c   :  { %v411_v32 = vpop.f32.mrf.mxu3 }
 0x14d   :  { %v412_v45 = vadd.f32 %v411_v32, %v346_v40  ;;  %v350_v51 = vpop.f32.mrf.mxu2 }
 0x14e   :  { %v499_v16 = vpop.f32.mrf.mxu1  ;;  %v351_v38 = vadd.f32 %v350_v51, %v290_v18 }
 0x14f   :  { %v452_v19 = vpop.f32.mrf.mxu0  ;;  %v500_v11 = vadd.f32 %v499_v16, %v449_v4 }
 0x150   :  { %v453_v0 = vadd.f32 %v452_v19, %v388_v59  ;;  %v1066_v19 = vand.u32 4294901760, %v543_v9 }
 0x152   :  { %v1082_v28 = vsub.f32 %v543_v9, %v1066_v19 }
 0x154   :  { %v417_v17 = vpop.f32.mrf.mxu3 }
 0x155   :  { %v418_v56 = vadd.f32 %v417_v17, %v351_v38 }
 0x156   :  { %v503_v21 = vpop.f32.mrf.mxu1 }
 0x157   :  { %v456_v22 = vpop.f32.mrf.mxu0  ;;  %v504_v7 = vadd.f32 %v503_v21, %v453_v0  ;;  %v527_v21 = vmax.f32 %v500_v11, 0.0 }
 0x158   :  { %v457_v61 = vadd.f32 %v456_v22, %v394_v53 }
 0x159   :  { %v528_v20 = vmax.f32 %v504_v7, 0.0  ;;  %v1094_v30 = vand.u32 4294901760, %v527_v21 }
 0x15b   :  { %v1084_v29 = vand.u32 4294901760, %v528_v20 }
 0x15d   :  { %v1106_v39 = vsub.f32 %v528_v20, %v1084_v29 }
 0x15e   :  { %v507_v26 = vpop.f32.mrf.mxu1 }
 0x15f   :  { %v460_v27 = vpop.f32.mrf.mxu0  ;;  %v508_v2 = vadd.f32 %v507_v26, %v457_v61  ;;  %v618_v51 = vand.u32 4294901760, %v1106_v39 }
 0x160   :  { %v461_v54 = vadd.f32 %v460_v27, %v400_v47  ;;  %v526_v27 = vmax.f32 %v1052_v14, 0.0 }
 0x161   :  { %v529_v6 = vmax.f32 %v508_v2, 0.0  ;;  %v619_v58 = vsub.f32 %v1106_v39, %v618_v51 }
 0x162   :  { %v1102_v36 = vand.u32 4294901760, %v526_v27 }
 0x163   :  { %v1073_v25 = vand.u32 4294901760, %v529_v6  ;;  %v620_v61 = vand.u32 4294901760, %v619_v58 }
 0x165   :  { %v1097_v32 = vsub.f32 %v529_v6, %v1073_v25  ;;  %v787_v6 = vpop.permute.xlu1 %786 }
 0x166   :  { %v511_v31 = vpop.f32.mrf.mxu1 }
 0x167   :  { %v464_v33 = vpop.f32.mrf.mxu0  ;;  %v512_v62 = vadd.f32 %v511_v31, %v461_v54  ;;  %v612_v47 = vand.u32 4294901760, %v1097_v32 }
 0x168   :  { %v465_v48 = vadd.f32 %v464_v33, %v406_v43  ;;  %v1115_v43 = vsub.f32 %v527_v21, %v1094_v30 }
 0x169   :  { %v530_v50 = vmax.f32 %v512_v62, 0.0  ;;  %v613_v53 = vsub.f32 %v1097_v32, %v612_v47 }
 0x16a   :  { %v624_v54 = vand.u32 4294901760, %v1115_v43 }
 0x16b   :  { %v1068_v22 = vand.u32 4294901760, %v530_v50  ;;  %v614_v17 = vand.u32 4294901760, %v613_v53 }
 0x16c   :  { %v625_v38 = vsub.f32 %v1115_v43, %v624_v54 }
 0x16d   :  { %v1087_v31 = vsub.f32 %v530_v50, %v1068_v22 }
 0x16e   :  { %v515_v35 = vpop.f32.mrf.mxu1 }
 0x16f   :  { %v468_v37 = vpop.f32.mrf.mxu0  ;;  %v516_v55 = vadd.f32 %v515_v35, %v465_v48  ;;  %v606_v42 = vand.u32 4294901760, %v1087_v31 }
 0x170   :  { %v469_v49 = vadd.f32 %v468_v37, %v412_v45  ;;  %v571_v37 = vand.u32 4294901760, %v1082_v28 }
 0x171   :  { %v531_v3 = vmax.f32 %v516_v55, 0.0  ;;  %v607_v24 = vsub.f32 %v1087_v31, %v606_v42 }
 0x172   :  { %v572_v48 = vsub.f32 %v1082_v28, %v571_v37 }
 0x173   :  { %v1064_v12 = vand.u32 4294901760, %v531_v3 }
 0x174   :  { %v573_v55 = vand.u32 4294901760, %v572_v48 }
 0x175   :  { %v1076_v26 = vsub.f32 %v531_v3, %v1064_v12 }
 0x176   :  { %v519_v52 = vpop.f32.mrf.mxu1 }
 0x177   :  { %v520_v57 = vadd.f32 %v519_v52, %v469_v49  ;;  %v472_v1 = vpop.f32.mrf.mxu0  ;;  %v600_v35 = vand.u32 4294901760, %v1076_v26  ;;  %v629_v49 = vsub.f32 %v526_v27, %v1102_v36 }
 0x178   :  { %v473_v5 = vadd.f32 %v472_v1, %v418_v56  ;;  %v539_v56 = vpop.permute.xlu0 %538 }
 0x179   :  { %v532_v60 = vmax.f32 %v520_v57, 0.0  ;;  %v601_v46 = vsub.f32 %v1076_v26, %v600_v35  ;;  %v608_v57 = vand.u32 4294901760, %v607_v24  ;;  %v630_v59 = vand.u32 4294901760, %v629_v49 }
 0x17b   :  { %v1062_v8 = vand.u32 4294901760, %v532_v60  ;;  %v602_v52 = vand.u32 4294901760, %v601_v46  ;;  %v631_v62 = vsub.f32 %v629_v49, %v630_v59 }
 0x17d   :  { %v1071_v23 = vsub.f32 %v532_v60, %v1062_v8  ;;  %v626_v60 = vand.u32 4294901760, %v625_v38  ;;  %v632_v63 = vand.u32 4294901760, %v631_v62 }
 0x17e   :  { %v523_v10 = vpop.f32.mrf.mxu1 }
 0x17f   :  { %v524_v15 = vadd.f32 %v523_v10, %v473_v5  ;;  %v594_v34 = vand.u32 4294901760, %v1071_v23 }
 0x181   :  { %v533_v13 = vmax.f32 %v524_v15, 0.0  ;;  %v595_v41 = vsub.f32 %v1071_v23, %v594_v34 }
 0x183   :  { %v1078_v16 = vand.u32 4294901760, %v533_v13  ;;  %v596_v18 = vand.u32 4294901760, %v595_v41 }
 0x185   :  { %v1090_v33 = vsub.f32 %v533_v13, %v1078_v16  ;;  %554 = vmatpush.msra.mxu2 %v1078_v16 }
 0x187   :  { %v588_v14 = vand.u32 4294901760, %v1090_v33  ;;  %556 = vmatpush.msra.mxu2 %v1062_v8 }
 0x189   :  { %v589_v40 = vsub.f32 %v1090_v33, %v588_v14  ;;  %558 = vmatpush.msra.mxu2 %v1064_v12 }
 0x18b   :  { %560 = vmatpush.msra.mxu2 %v1068_v22  ;;  %v590_v45 = vand.u32 4294901760, %v589_v40 }
 0x18d   :  { %562 = vmatpush.msra.mxu2 %v1073_v25  ;;  %591 = vmatpush.msra.mxu3 %v590_v45 }
 0x18f   :  { %564 = vmatpush.msra.mxu2 %v1084_v29  ;;  %597 = vmatpush.msra.mxu3 %v596_v18 }
 0x191   :  { %566 = vmatpush.msra.mxu2 %v1094_v30  ;;  %603 = vmatpush.msra.mxu3 %v602_v52 }
 0x193   :  { %568 = vmatpush.msra.mxu2 %v1102_v36  ;;  %609 = vmatpush.msra.mxu3 %v608_v57 }
 0x194   :  { %574 = vmatmul.f32.vlgmr.msra.gmra.mxu2 %v573_v55 }
 0x195   :  { %649 = vmatpush.msrb.mxu2 %v1090_v33  ;;  %615 = vmatpush.msra.mxu3 %v614_v17 }
 0x197   :  { %652 = vmatpush.msrb.mxu2 %v1071_v23  ;;  %621 = vmatpush.msra.mxu3 %v620_v61  ;;  %v800_v23 = vpop.permute.xlu2 %799 }
 0x198   :  { %v802_v21 = vperm.slane %v800_v23, 0 }
 0x199   :  { %655 = vmatpush.msrb.mxu2 %v1076_v26  ;;  %627 = vmatpush.msra.mxu3 %v626_v60 }
 0x19b   :  { %658 = vmatpush.msrb.mxu2 %v1087_v31  ;;  %633 = vmatpush.msra.mxu3 %v632_v63 }
 0x19c   :  { %635 = vmatmul.f32.vlgmr.msra.gmra.mxu3 %v1066_v19 }
 0x19d   :  { %661 = vmatpush.msrb.mxu2 %v1097_v32  ;;  %686 = vmatpush.msrb.mxu3 %v1078_v16 }
 0x19f   :  { %664 = vmatpush.msrb.mxu2 %v1106_v39  ;;  %688 = vmatpush.msrb.mxu3 %v1062_v8 }
 0x1a1   :  { %667 = vmatpush.msrb.mxu2 %v1115_v43  ;;  %690 = vmatpush.msrb.mxu3 %v1064_v12 }
 0x1a3   :  { %670 = vmatpush.msrb.mxu2 %v629_v49  ;;  %692 = vmatpush.msrb.mxu3 %v1068_v22 }
 0x1a4   :  { %673 = vmatmul.f32.vlgmr.msrb.gmra.mxu2 %v1082_v28 }
 0x1a5   :  { %719 = vmatpush.msra.mxu2 %v588_v14  ;;  %694 = vmatpush.msrb.mxu3 %v1073_v25 }
 0x1a7   :  { %723 = vmatpush.msra.mxu2 %v594_v34  ;;  %696 = vmatpush.msrb.mxu3 %v1084_v29 }
 0x1a9   :  { %727 = vmatpush.msra.mxu2 %v600_v35  ;;  %698 = vmatpush.msrb.mxu3 %v1094_v30 }
 0x1ab   :  { %731 = vmatpush.msra.mxu2 %v606_v42  ;;  %700 = vmatpush.msrb.mxu3 %v1102_v36 }
 0x1ac   :  { %704 = vmatmul.f32.vlgmr.msrb.gmra.mxu3 %v571_v37 }
 0x1ad   :  { %735 = vmatpush.msra.mxu2 %v612_v47  ;;  %762 = vmatpush.msra.mxu3 %v1078_v16 }
 0x1af   :  { %739 = vmatpush.msra.mxu2 %v618_v51  ;;  %764 = vmatpush.msra.mxu3 %v1062_v8 }
 0x1b1   :  { %743 = vmatpush.msra.mxu2 %v624_v54  ;;  %766 = vmatpush.msra.mxu3 %v1064_v12 }
 0x1b3   :  { %747 = vmatpush.msra.mxu2 %v630_v59  ;;  %768 = vmatpush.msra.mxu3 %v1068_v22 }
 0x1b4   :  { %749 = vmatmul.f32.vlgmr.msra.gmra.mxu2 %v1066_v19 }
 0x1b5   :  { %770 = vmatpush.msra.mxu3 %v1073_v25 }
 0x1b7   :  { %772 = vmatpush.msra.mxu3 %v1084_v29 }
 0x1b9   :  { %774 = vmatpush.msra.mxu3 %v1094_v30 }
 0x1bb   :  { %776 = vmatpush.msra.mxu3 %v1102_v36 }
 0x1bc   :  { %778 = vmatmul.f32.vlgmr.msra.gmra.mxu3 %v1066_v19 }
 0x217   :  { %v575_v0 = vpop.f32.mrf.mxu2 }
 0x218   :  { %v576_v2 = vadd.f32 %v575_v0, %v539_v56 }
 0x21f   :  { %v636_v1 = vpop.f32.mrf.mxu3 }
 0x220   :  { %v637_v4 = vadd.f32 %v636_v1, %v576_v2 }
 0x227   :  { %v674_v44 = vpop.f32.mrf.mxu2 }
 0x228   :  { %v675_v7 = vadd.f32 %v674_v44, %v637_v4 }
 0x22f   :  { %v705_v3 = vpop.f32.mrf.mxu3 }
 0x230   :  { %v706_v5 = vadd.f32 %v705_v3, %v675_v7 }
 0x237   :  { %v750_v50 = vpop.f32.mrf.mxu2 }
 0x238   :  { %v751_v8 = vadd.f32 %v750_v50, %v706_v5 }
 0x23f   :  { %v779_v9 = vpop.f32.mrf.mxu3 }
 0x240   :  { %v780_v10 = vadd.f32 %v779_v9, %v751_v8 }
 0x242   :  { %v782_v11 = vmax.f32 %v780_v10, 0.0 }
 0x244   :  { %v789_v12 = vmul.f32 %v787_v6, %v782_v11 }
 0x246   :  { %v790_v15 = vrot.slane %v789_v12, 4 }
 0x248   :  { %v791_v20 = vadd.f32 %v790_v15, %v789_v12 }
 0x24a   :  { %v792_v22 = vrot.slane %v791_v20, 2 }
 0x24c   :  { %v793_v19 = vadd.f32 %v792_v22, %v791_v20 }
 0x24e   :  { %v794_v13 = vrot.slane %v793_v19, 1 }
 0x250   :  { %v795_v25 = vadd.f32 %v794_v13, %v793_v19 }
 0x252   :  { %v803_v26 = vadd.f32 %v802_v21, %v795_v25 }
 0x254   :  { %804 = vst [vmem:[#allocation3] sm:$0x1] %v803_v26 }
 0x255   :  { %815 = dma.vmem_to_hbm [thread:$0]  %s811_s27, 16, %s813_s30, [#allocation4]  }
 0x256   :  { %855 = dma.done.wait [#allocation4], 16  }
 0x257   :  { %856 = vsyncadd [#allocation4], 4294967280 }
 0x258   :  { %820 = vsyncpa [#allocation4], 1 }

</bundles_post_ra>
